<compile_context>
chip_gen: v7x
topology: tpu7x:2x2x1
jax: 0.10.0
libtpu: 0.0.40
codegen_flags: <defaults>
</compile_context>

<pallas_src>
import jax
import jax.numpy as jnp
from jax.experimental import pallas as pl
from jax.experimental.pallas import tpu as pltpu


def _pam_kernel(x_ref, wq_ref, wk_ref, wv_ref, bq_ref, bk_ref, bv_ref,
                gamma_ref, out_ref, kT_scr, v_scr):
    tq = out_ref.shape[2]
    i = pl.program_id(1)
    q_start = pl.multiple_of(i * tq, tq)
    bf16 = jnp.bfloat16

    # ---- once per batch: project K and V over the whole spatial extent into VMEM scratch.
    #      Correct because the query axis is "arbitrary" (sequential) and resets per batch.
    @pl.when(i == 0)
    def _():
        x_all = x_ref[0].astype(bf16)                                    # (C, N)
        k = jnp.dot(wk_ref[...], x_all,
                    preferred_element_type=jnp.float32) + bk_ref[...]    # (Ck, N) f32
        v = jnp.dot(wv_ref[...], x_all,
                    preferred_element_type=jnp.float32) + bv_ref[...]    # (C,  N) f32
        # store K transposed once per batch so the per-tile energy matmul is a natural
        # (N, Ck) @ (Ck, tq) NN matmul with no transposed contractions inside the loop.
        kT_scr[...] = jnp.transpose(k).astype(kT_scr.dtype)              # (N, Ck) bf16
        v_scr[...] = v.astype(v_scr.dtype)                               # (C, N)  bf16

    # ---- per query tile -------------------------------------------------------------
    x_q = x_ref[0, :, pl.ds(q_start, tq)]                                # (C, tq) f32
    q = jnp.dot(wq_ref[...], x_q.astype(bf16),
                preferred_element_type=jnp.float32) + bq_ref[...]        # (Ck, tq) f32

    # energy^T[k, q] = sum_ck K[ck, k] * Q[ck, q]   (keys on sublanes, queries on lanes)
    e_t = jnp.dot(kT_scr[...], q.astype(bf16),
                  preferred_element_type=jnp.float32)                    # (N, tq) f32

    # softmax over keys (axis 0) in f32; normalization deferred past the PV matmul.
    m = jnp.max(e_t, axis=0, keepdims=True)                              # (1, tq)
    p = jnp.exp(e_t - m)                                                 # (N, tq)
    s = jnp.sum(p, axis=0, keepdims=True)                                # (1, tq)
    # TODO(synk): key-chunked (flash-style) online softmax for very large N on v7x.

    out = jnp.dot(v_scr[...], p.astype(bf16),
                  preferred_element_type=jnp.float32)                    # (C, tq) f32
    out = out * pl.reciprocal(s, approx=True)

    out_ref[0] = (gamma_ref[0, 0] * out + x_q).astype(out_ref.dtype)


def pam_forward(x, wq, bq, wk, bk, wv, bv, gamma, *, tq=128):
    """Position Attention Module forward.

    x:  (B, C, H, W, 1)            (squeeze(-1) is done here, matching the torch forward)
    wq: (C//8, C), bq: (C//8,)     query 1x1 conv
    wk: (C//8, C), bk: (C//8,)     key   1x1 conv
    wv: (C, C),    bv: (C,)        value 1x1 conv
    gamma: (1,)
    returns (B, C, H, W, 1)

    tq: query tile (multiple of 128). Raise to 256-512 on v5e/v6e for large N; keep 128 on v7x.
    """
    B, C, H, W, _ = x.shape
    N = H * W
    Ck = wq.shape[0]
    f32 = jnp.float32
    bf16 = jnp.bfloat16

    tq = min(tq, N)
    if tq % 128 != 0 or N % tq != 0:
        # TODO(synk): ragged query tiles (masking / pl.BoundedSlice); fall back to one full tile.
        tq = N
    n_q = N // tq

    # channel-major layout everywhere: reshape only, no HBM transposes in the wrapper.
    x3 = x.reshape(B, C, N).astype(f32)
    wq_b = wq.astype(bf16)
    wk_b = wk.astype(bf16)
    wv_b = wv.astype(bf16)
    bq2 = bq.astype(f32).reshape(Ck, 1)
    bk2 = bk.astype(f32).reshape(Ck, 1)
    bv2 = bv.astype(f32).reshape(C, 1)
    gamma2 = gamma.astype(f32).reshape(1, 1)

    const = lambda b, i: (0, 0)

    out3 = pl.pallas_call(
        _pam_kernel,
        out_shape=jax.ShapeDtypeStruct((B, C, N), f32),
        grid_spec=pltpu.PrefetchScalarGridSpec(
            num_scalar_prefetch=0,
            grid=(B, n_q),
            in_specs=[
                pl.BlockSpec((1, C, N), lambda b, i: (b, 0, 0)),  # resident across query tiles
                pl.BlockSpec((Ck, C), const),
                pl.BlockSpec((Ck, C), const),
                pl.BlockSpec((C, C), const),
                pl.BlockSpec((Ck, 1), const),
                pl.BlockSpec((Ck, 1), const),
                pl.BlockSpec((C, 1), const),
                pl.BlockSpec((1, 1), const, memory_space=pltpu.SMEM),
            ],
            out_specs=pl.BlockSpec((1, C, tq), lambda b, i: (b, 0, i)),
            scratch_shapes=[
                pltpu.VMEM((N, Ck), bf16),   # K^T, computed once per batch
                pltpu.VMEM((C, N), bf16),    # V,   computed once per batch
            ],
        ),
        compiler_params=pltpu.CompilerParams(
            # query axis MUST be "arbitrary": K/V scratch is reused across query tiles.
            # batch axis stays "parallel" so the second TensorCore (v7x) gets whole batches.
            dimension_semantics=("parallel", "arbitrary"),
            vmem_limit_bytes=48 * 1024 * 1024,
        ),
    )(x3, wq_b, wk_b, wv_b, bq2, bk2, bv2, gamma2)

    # channel-major output -> plain reshape, no transpose.
    return out3.reshape(B, C, H, W)[..., None]


def _reference(x, wq, bq, wk, bk, wv, bv, gamma):
    """Pure-JAX transcription of PAM_Module.forward (f32, HIGHEST precision)."""
    B, C, H, W, _ = x.shape
    N = H * W
    hp = jax.lax.Precision.HIGHEST
    xs = x.reshape(B, C, N).astype(jnp.float32)
    q = jnp.einsum('oc,bcn->bon', wq, xs, precision=hp) + bq[None, :, None]
    k = jnp.einsum('oc,bcn->bon', wk, xs, precision=hp) + bk[None, :, None]
    v = jnp.einsum('oc,bcn->bon', wv, xs, precision=hp) + bv[None, :, None]
    energy = jnp.einsum('bcq,bck->bqk', q, k, precision=hp)           # bmm(Q^T, K)
    attn = jax.nn.softmax(energy, axis=-1)
    out = jnp.einsum('bcn,bqn->bcq', v, attn, precision=hp)           # bmm(V, attn^T)
    res = gamma.reshape(()) * out + xs
    return res.reshape(B, C, H, W)[..., None]


if __name__ == "__main__":
    B, C, H, W = 2, 16, 16, 16          # in_dim=16 -> query/key project to C//8 = 2 channels
    Ck = C // 8

    key = jax.random.PRNGKey(0)
    k_x, k_wq, k_bq, k_wk, k_bk, k_wv, k_bv = jax.random.split(key, 7)
    x = jax.random.normal(k_x, (B, C, H, W, 1), dtype=jnp.float32)
    wq = jax.random.normal(k_wq, (Ck, C), dtype=jnp.float32) * 0.2
    bq = jax.random.normal(k_bq, (Ck,), dtype=jnp.float32) * 0.1
    wk = jax.random.normal(k_wk, (Ck, C), dtype=jnp.float32) * 0.2
    bk = jax.random.normal(k_bk, (Ck,), dtype=jnp.float32) * 0.1
    wv = jax.random.normal(k_wv, (C, C), dtype=jnp.float32) * 0.2
    bv = jax.random.normal(k_bv, (C,), dtype=jnp.float32) * 0.1
    # module init is gamma=0 (output would trivially equal x); use a nonzero gamma so the
    # attention branch is actually exercised by the correctness check.
    gamma = jnp.full((1,), 0.5, dtype=jnp.float32)

    # tq=128 with N=256 -> 2 query tiles per batch, exercising the per-batch K/V scratch reuse.
    out = pam_forward(x, wq, bq, wk, bk, wv, bv, gamma, tq=128)
    jax.block_until_ready(out)

    ref = _reference(x, wq, bq, wk, bk, wv, bv, gamma)
    assert out.shape == (B, C, H, W, 1)
    # bf16 MXU operands + approx reciprocal -> loosened tolerance vs the HIGHEST-f32 reference.
    max_err = float(jnp.max(jnp.abs(out - ref)))
    assert jnp.allclose(out, ref, atol=3e-2, rtol=3e-2), max_err

    print("KERNEL_OK")
</pallas_src>

<mosaic_0001>
module attributes {stable_mosaic.version = 11 : i64} {
  func.func @_pam_kernel(%arg0: i32, %arg1: i32, %arg2: memref<1x16x256xf32, #tpu.memory_space<vmem>>, %arg3: memref<2x16xbf16, #tpu.memory_space<vmem>>, %arg4: memref<2x16xbf16, #tpu.memory_space<vmem>>, %arg5: memref<16x16xbf16, #tpu.memory_space<vmem>>, %arg6: memref<2x1xf32, #tpu.memory_space<vmem>>, %arg7: memref<2x1xf32, #tpu.memory_space<vmem>>, %arg8: memref<16x1xf32, #tpu.memory_space<vmem>>, %arg9: memref<1x1xf32, #tpu.memory_space<smem>>, %arg10: memref<1x16x128xf32, #tpu.memory_space<vmem>>, %arg11: memref<256x2xbf16, #tpu.memory_space<vmem>>, %arg12: memref<16x256xbf16, #tpu.memory_space<vmem>>) attributes {dimension_semantics = [#tpu.dimension_semantics<parallel>, #tpu.dimension_semantics<arbitrary>], iteration_bounds = array<i64: 2, 2>, scalar_prefetch = 0 : i64, scratch_operands = 2 : i64, tpu.core_type = #tpu.core_type<tc>, window_params = [{transform_indices = @transform_0, window_bounds = array<i64: 1, 16, 256>}, {pipeline_mode = #tpu.pipeline_mode<synchronous>, transform_indices = @transform_1, window_bounds = array<i64: 2, 16>}, {pipeline_mode = #tpu.pipeline_mode<synchronous>, transform_indices = @transform_2, window_bounds = array<i64: 2, 16>}, {pipeline_mode = #tpu.pipeline_mode<synchronous>, transform_indices = @transform_3, window_bounds = array<i64: 16, 16>}, {pipeline_mode = #tpu.pipeline_mode<synchronous>, transform_indices = @transform_4, window_bounds = array<i64: 2, 1>}, {pipeline_mode = #tpu.pipeline_mode<synchronous>, transform_indices = @transform_5, window_bounds = array<i64: 2, 1>}, {pipeline_mode = #tpu.pipeline_mode<synchronous>, transform_indices = @transform_6, window_bounds = array<i64: 16, 1>}, {transform_indices = @transform_7, window_bounds = array<i64: 1, 1>}, {transform_indices = @transform_8, window_bounds = array<i64: 1, 16, 128>}]} {
    %c128_i32 = arith.constant 128 : i32
    %0 = arith.muli %arg1, %c128_i32 : i32
    %1 = tpu.assume_multiple %0, 128 : i32
    %c0_i32 = arith.constant 0 : i32
    %2 = arith.cmpi eq, %arg1, %c0_i32 : i32
    %3 = arith.extui %2 : i1 to i32
    %c0_i32_0 = arith.constant 0 : i32
    %4 = arith.cmpi ne, %3, %c0_i32_0 : i32
    scf.if %4 {
      %c0_19 = arith.constant 0 : index
      %c0_20 = arith.constant 0 : index
      %c0_21 = arith.constant 0 : index
      %37 = vector.load %arg2[%c0_19, %c0_20, %c0_21] : memref<1x16x256xf32, #tpu.memory_space<vmem>>, vector<1x16x256xf32>
      %38 = vector.shape_cast %37 : vector<1x16x256xf32> to vector<16x256xf32>
      %39 = arith.truncf %38 : vector<16x256xf32> to vector<16x256xbf16>
      %c0_22 = arith.constant 0 : index
      %c0_23 = arith.constant 0 : index
      %40 = vector.load %arg4[%c0_22, %c0_23] : memref<2x16xbf16, #tpu.memory_space<vmem>>, vector<2x16xbf16>
      %cst_24 = arith.constant dense<0.000000e+00> : vector<2x256xf32>
      %41 = tpu.matmul %40, %39, %cst_24 {dimension_numbers = #tpu.dot_dimension_numbers<[1], [0], [0], [1], [0, 0, 1, 1], [], []>} : vector<2x16xbf16>, vector<16x256xbf16>, vector<2x256xf32> -> vector<2x256xf32>
      %c0_25 = arith.constant 0 : index
      %c0_26 = arith.constant 0 : index
      %42 = vector.load %arg7[%c0_25, %c0_26] : memref<2x1xf32, #tpu.memory_space<vmem>>, vector<2x1xf32>
      %43 = vector.broadcast %42 : vector<2x1xf32> to vector<2x256xf32>
      %44 = arith.addf %41, %43 : vector<2x256xf32>
      %c0_27 = arith.constant 0 : index
      %c0_28 = arith.constant 0 : index
      %45 = vector.load %arg5[%c0_27, %c0_28] : memref<16x16xbf16, #tpu.memory_space<vmem>>, vector<16x16xbf16>
      %cst_29 = arith.constant dense<0.000000e+00> : vector<16x256xf32>
      %46 = tpu.matmul %45, %39, %cst_29 {dimension_numbers = #tpu.dot_dimension_numbers<[1], [0], [0], [1], [0, 0, 1, 1], [], []>} : vector<16x16xbf16>, vector<16x256xbf16>, vector<16x256xf32> -> vector<16x256xf32>
      %c0_30 = arith.constant 0 : index
      %c0_31 = arith.constant 0 : index
      %47 = vector.load %arg8[%c0_30, %c0_31] : memref<16x1xf32, #tpu.memory_space<vmem>>, vector<16x1xf32>
      %48 = vector.broadcast %47 : vector<16x1xf32> to vector<16x256xf32>
      %49 = arith.addf %46, %48 : vector<16x256xf32>
      %50 = tpu.transpose %44, [1, 0] : vector<2x256xf32> -> vector<256x2xf32>
      %51 = arith.truncf %50 : vector<256x2xf32> to vector<256x2xbf16>
      %c0_32 = arith.constant 0 : index
      %c0_33 = arith.constant 0 : index
      %52 = vector.load %arg11[%c0_32, %c0_33] : memref<256x2xbf16, #tpu.memory_space<vmem>>, vector<256x2xbf16>
      tpu.vector_store %arg11[%c0_32, %c0_33], %51 {strides = array<i32>} : memref<256x2xbf16, #tpu.memory_space<vmem>>, vector<256x2xbf16>,
      %53 = arith.truncf %49 : vector<16x256xf32> to vector<16x256xbf16>
      %c0_34 = arith.constant 0 : index
      %c0_35 = arith.constant 0 : index
      %54 = vector.load %arg12[%c0_34, %c0_35] : memref<16x256xbf16, #tpu.memory_space<vmem>>, vector<16x256xbf16>
      tpu.vector_store %arg12[%c0_34, %c0_35], %53 {strides = array<i32>} : memref<16x256xbf16, #tpu.memory_space<vmem>>, vector<16x256xbf16>,
    } else {
    }
    %c0 = arith.constant 0 : index
    %c0_1 = arith.constant 0 : index
    %5 = arith.index_cast %1 : i32 to index
    %6 = vector.load %arg2[%c0, %c0_1, %5] : memref<1x16x256xf32, #tpu.memory_space<vmem>>, vector<1x16x128xf32>
    %7 = vector.shape_cast %6 : vector<1x16x128xf32> to vector<16x128xf32>
    %c0_2 = arith.constant 0 : index
    %c0_3 = arith.constant 0 : index
    %8 = vector.load %arg3[%c0_2, %c0_3] : memref<2x16xbf16, #tpu.memory_space<vmem>>, vector<2x16xbf16>
    %9 = arith.truncf %7 : vector<16x128xf32> to vector<16x128xbf16>
    %cst = arith.constant dense<0.000000e+00> : vector<2x128xf32>
    %10 = tpu.matmul %8, %9, %cst {dimension_numbers = #tpu.dot_dimension_numbers<[1], [0], [0], [1], [0, 0, 1, 1], [], []>} : vector<2x16xbf16>, vector<16x128xbf16>, vector<2x128xf32> -> vector<2x128xf32>
    %c0_4 = arith.constant 0 : index
    %c0_5 = arith.constant 0 : index
    %11 = vector.load %arg6[%c0_4, %c0_5] : memref<2x1xf32, #tpu.memory_space<vmem>>, vector<2x1xf32>
    %12 = vector.broadcast %11 : vector<2x1xf32> to vector<2x128xf32>
    %13 = arith.addf %10, %12 : vector<2x128xf32>
    %c0_6 = arith.constant 0 : index
    %c0_7 = arith.constant 0 : index
    %14 = vector.load %arg11[%c0_6, %c0_7] : memref<256x2xbf16, #tpu.memory_space<vmem>>, vector<256x2xbf16>
    %15 = arith.truncf %13 : vector<2x128xf32> to vector<2x128xbf16>
    %cst_8 = arith.constant dense<0.000000e+00> : vector<256x128xf32>
    %16 = tpu.matmul %14, %15, %cst_8 {dimension_numbers = #tpu.dot_dimension_numbers<[1], [0], [0], [1], [0, 0, 1, 1], [], []>} : vector<256x2xbf16>, vector<2x128xbf16>, vector<256x128xf32> -> vector<256x128xf32>
    %cst_9 = arith.constant dense<0xFF800000> : vector<128xf32>
    %17 = vector.multi_reduction <maximumf>, %16, %cst_9 [0] : vector<256x128xf32> to vector<128xf32>
    %18 = vector.shape_cast %17 : vector<128xf32> to vector<1x128xf32>
    %19 = vector.broadcast %18 : vector<1x128xf32> to vector<256x128xf32>
    %20 = arith.subf %16, %19 : vector<256x128xf32>
    %21 = math.exp %20 : vector<256x128xf32>
    %cst_10 = arith.constant dense<0.000000e+00> : vector<128xf32>
    %22 = vector.multi_reduction <add>, %21, %cst_10 [0] : vector<256x128xf32> to vector<128xf32>
    %23 = vector.shape_cast %22 : vector<128xf32> to vector<1x128xf32>
    %c0_11 = arith.constant 0 : index
    %c0_12 = arith.constant 0 : index
    %24 = vector.load %arg12[%c0_11, %c0_12] : memref<16x256xbf16, #tpu.memory_space<vmem>>, vector<16x256xbf16>
    %25 = arith.truncf %21 : vector<256x128xf32> to vector<256x128xbf16>
    %cst_13 = arith.constant dense<0.000000e+00> : vector<16x128xf32>
    %26 = tpu.matmul %24, %25, %cst_13 {dimension_numbers = #tpu.dot_dimension_numbers<[1], [0], [0], [1], [0, 0, 1, 1], [], []>} : vector<16x256xbf16>, vector<256x128xbf16>, vector<16x128xf32> -> vector<16x128xf32>
    %27 = tpu.reciprocal %23 {approx = true} : vector<1x128xf32> -> vector<1x128xf32>
    %28 = vector.broadcast %27 : vector<1x128xf32> to vector<16x128xf32>
    %29 = arith.mulf %26, %28 : vector<16x128xf32>
    %c0_14 = arith.constant 0 : index
    %c0_15 = arith.constant 0 : index
    %30 = memref.load %arg9[%c0_14, %c0_15] : memref<1x1xf32, #tpu.memory_space<smem>>
    %31 = vector.broadcast %30 : f32 to vector<16x128xf32>
    %32 = arith.mulf %31, %29 : vector<16x128xf32>
    %33 = arith.addf %32, %7 : vector<16x128xf32>
    %c0_16 = arith.constant 0 : index
    %c0_17 = arith.constant 0 : index
    %c0_18 = arith.constant 0 : index
    %34 = vector.load %arg10[%c0_16, %c0_17, %c0_18] : memref<1x16x128xf32, #tpu.memory_space<vmem>>, vector<1x16x128xf32>
    %35 = vector.shape_cast %34 : vector<1x16x128xf32> to vector<16x128xf32>
    %36 = vector.shape_cast %33 : vector<16x128xf32> to vector<1x16x128xf32>
    tpu.vector_store %arg10[%c0_16, %c0_17, %c0_18], %36 {strides = array<i32>} : memref<1x16x128xf32, #tpu.memory_space<vmem>>, vector<1x16x128xf32>,
    return
  }
  func.func @transform_0(%arg0: i32, %arg1: i32) -> (i32, i32, i32) {
    %c0_i32 = arith.constant 0 : i32
    %c0_i32_0 = arith.constant 0 : i32
    %c0_i32_1 = arith.constant 0 : i32
    return %arg0, %c0_i32, %c0_i32_0 : i32, i32, i32
  }
  func.func @transform_1(%arg0: i32, %arg1: i32) -> (i32, i32) {
    %c0_i32 = arith.constant 0 : i32
    %c0_i32_0 = arith.constant 0 : i32
    %c0_i32_1 = arith.constant 0 : i32
    return %c0_i32, %c0_i32_0 : i32, i32
  }
  func.func @transform_2(%arg0: i32, %arg1: i32) -> (i32, i32) {
    %c0_i32 = arith.constant 0 : i32
    %c0_i32_0 = arith.constant 0 : i32
    %c0_i32_1 = arith.constant 0 : i32
    return %c0_i32, %c0_i32_0 : i32, i32
  }
  func.func @transform_3(%arg0: i32, %arg1: i32) -> (i32, i32) {
    %c0_i32 = arith.constant 0 : i32
    %c0_i32_0 = arith.constant 0 : i32
    %c0_i32_1 = arith.constant 0 : i32
    return %c0_i32, %c0_i32_0 : i32, i32
  }
  func.func @transform_4(%arg0: i32, %arg1: i32) -> (i32, i32) {
    %c0_i32 = arith.constant 0 : i32
    %c0_i32_0 = arith.constant 0 : i32
    %c0_i32_1 = arith.constant 0 : i32
    return %c0_i32, %c0_i32_0 : i32, i32
  }
  func.func @transform_5(%arg0: i32, %arg1: i32) -> (i32, i32) {
    %c0_i32 = arith.constant 0 : i32
    %c0_i32_0 = arith.constant 0 : i32
    %c0_i32_1 = arith.constant 0 : i32
    return %c0_i32, %c0_i32_0 : i32, i32
  }
  func.func @transform_6(%arg0: i32, %arg1: i32) -> (i32, i32) {
    %c0_i32 = arith.constant 0 : i32
    %c0_i32_0 = arith.constant 0 : i32
    %c0_i32_1 = arith.constant 0 : i32
    return %c0_i32, %c0_i32_0 : i32, i32
  }
  func.func @transform_7(%arg0: i32, %arg1: i32) -> (i32, i32) {
    %c0_i32 = arith.constant 0 : i32
    %c0_i32_0 = arith.constant 0 : i32
    %c0_i32_1 = arith.constant 0 : i32
    return %c0_i32, %c0_i32_0 : i32, i32
  }
  func.func @transform_8(%arg0: i32, %arg1: i32) -> (i32, i32, i32) {
    %c0_i32 = arith.constant 0 : i32
    %c0_i32_0 = arith.constant 0 : i32
    return %arg0, %c0_i32, %arg1 : i32, i32, i32
  }
}

</mosaic_0001>

<bundles_post_ra>
// kernel: tpu_custom_call.1
= control target key start
LH: loop header
LB: loop body
LE: loop exit
PB: predicated region body
PF: predicated region fallthrough
CT: control target
= control target key end

     0   :  { %s2382_s0 = inlined_call_operand.hbm [shape: f32[2,16,256], index: 0, kind: input, shape index: {}]   ;;  %s2383_s1 = inlined_call_operand.vmem [shape: bf16[2,16], index: 1, kind: input, shape index: {}]   ;;  %s2384_s2 = inlined_call_operand.vmem [shape: bf16[2,16], index: 2, kind: input, shape index: {}]   ;;  %s2385_s3 = inlined_call_operand.vmem [shape: bf16[16,16], index: 3, kind: input, shape index: {}]   ;;  %s2386_s4 = inlined_call_operand.vmem [shape: f32[2,1], index: 4, kind: input, shape index: {}]   ;;  %s2387_s5 = inlined_call_operand.vmem [shape: f32[2,1], index: 5, kind: input, shape index: {}]   ;;  %s2388_s6 = inlined_call_operand.vmem [shape: f32[16,1], index: 6, kind: input, shape index: {}]   ;;  %s2389_s7 = inlined_call_operand.<no memory space> [shape: f32[1,1], index: 7, kind: input, shape index: {}]   ;;  %s2390_s8 = inlined_call_operand.hbm [shape: f32[2,16,256], index: 8, kind: output, shape index: {}]  }
   0x1   :  { %2397 = sst [smem:[#allocation15_spill]] %s2390_s8 }
   0x2   :  { %13 = sst [smem:[#allocation4]] %s2389_s7 }
   0x3   :  { %14 = vsyncpa [#allocation6], 0 }
   0x4   :  { %16 = vsyncpa [#allocation6 + $0x1], 0 }
   0x5   :  { %17 = vsyncpa [#allocation7], 0 }
   0x6   :  { %19 = vsyncpa [#allocation7 + $0x1], 0  ;;  %s1799_s29 = smov 0   ;;  %s1801_s30 = smov 0  }
   0x7   :  { %s1803_s9 = smov 0   ;;  %s1805_s10 = smov 0  }
   0x8   :  { %s1807_s11 = smov 0   ;;  %s1809_s12 = smov 0  }
   0x9   :  { %s1811_s13 = smov 0   ;;  %s1813_s14 = smov 0  }
   0xa   :  { %s1815_s7 = smov 0   ;;  %s1817_s15 = smov 0  }
   0xb   :  { %s1819_s16 = smov 0  }
   0xc LB: > { %2398 = sst [smem:[#allocation11_spill]] %s1730_s7  ;;  %s1201_s17 = sadd.s32 4294967295, %s1738_s16   ;;  %s1738_s16 = sphi %s1819_s16, %s25_s16   ;;  %s1734_s15 = sphi %s1817_s15, %s2415_s15   ;;  %s1730_s7 = sphi %s1815_s7, %s2414_s7   ;;  %s1726_s14 = sphi %s1813_s14, %s2413_s14   ;;  %s1722_s13 = sphi %s1811_s13, %s2412_s13   ;;  %s1718_s12 = sphi %s1809_s12, %s2421_s12   ;;  %s1714_s11 = sphi %s1807_s11, %s2420_s11   ;;  %s1710_s10 = sphi %s1805_s10, %s2419_s10   ;;  %s1706_s9 = sphi %s1803_s9, %s2418_s9   ;;  %s1702_s30 = sphi %s1801_s30, %s2417_s30   ;;  %s1698_s29 = sphi %s1799_s29, %s2416_s29  }
   0xd   : > { %2399 = sst [smem:[#allocation12_spill]] %s1734_s15  ;;  %s1202_s18 = sadd.s32 4294967294, %s1738_s16  }
   0xe   : > { %s34_s19 = sadd.s32 1, %s1730_s7  ;;  %s37_s20 = sadd.s32 1, %s1734_s15 }
   0xf   : > { %p35_p0 = scmp.ge.s32.totalorder %s34_s19, 2  ;;  %s44_s21 = sadd.s32 1, %s1718_s12 }
  0x10   : > { %p51_p1 = scmp.ne.s32.totalorder %s1718_s12, %s1714_s11  ;;  %p52_p2 = scmp.eq.s32.totalorder %s1738_s16, 0 }
  0x11   : > { %s2423_s19 = smov (%p35_p0, %s34_s19), 0  ;;  %s2425_s20 = smov (!%p35_p0, %s37_s20), %s1734_s15 }
  0x12   : > { %2400 = sst [smem:[#allocation13_spill]] %s2423_s19  ;;  %p1863_p3 = por %p52_p2, %p51_p1 }
  0x13   : > { %p57_p4 = scmp.ne.s32.totalorder %s1714_s11, %s1710_s10  ;;  %p39_p5 = scmp.ge.s32.totalorder %s2425_s20, 2 }
  0x14   : > { %p58_p6 = scmp.eq.s32.totalorder %s1201_s17, 0  ;;  %s215_s23 = ssub.s32 %s1730_s7, %s2423_s19 }
  0x15   : > { %s219_s24 = sadd.s32 1, %s1706_s9  ;;  %s2427_s20 = smov (%p39_p5, %s2425_s20), 0 }
  0x16   : > { %2402 = sst [smem:[#allocation14_spill]] %s2427_s20  ;;  %p1873_p7 = por %p58_p6, %p57_p4 }
  0x17   : > { %p229_p8 = scmp.ne.s32.totalorder %s1706_s9, %s1702_s30  ;;  %s41_s26 = ssub.s32 %s1734_s15, %s2427_s20 }
  0x18   : > { %p230_p9 = scmp.eq.s32.totalorder %s1201_s17, 3  ;;  %p42_p10 = scmp.eq.s32.totalorder %s41_s26, 0 }
  0x19   : > { %s216_s27 = sor.u32 %s215_s23, %s41_s26  ;;  %p235_p13 = scmp.ne.s32.totalorder %s1702_s30, %s1698_s29 }
  0x1a   : > { %p217_p11 = scmp.eq.s32.totalorder %s216_s27, 0  ;;  %p1881_p12 = por %p230_p9, %p229_p8 }
  0x1b   : > { %s1886_s10 = scalar_select %p42_p10, %s1718_s12, %s44_s21  }
  0x1c   : > { %s2404_s28 = scalar_select %p1881_p12, 1, 0 }
  0x1d   : > { %s1889_s19 = scalar_select %p217_p11, %s1706_s9, %s219_s24  }
  0x1e   : > { %p236_p0 = scmp.eq.s32.totalorder %s1202_s18, 3  ;;  %p1334_p1 = scmp.lt.s32.totalorder %s1738_s16, 4 }
  0x1f   : > { %s277_s17 = sand.u32 1, %s1718_s12   ;;  %s1239_s26 = sshll.u32 %s1734_s15, 9 }
  0x20   : > { %p1894_p2 = por %p236_p0, %p235_p13  ;;  %s1205_s23 = sshll.u32 %s277_s17, 5 }
  0x21   : > { %s1903_s8 = scalar_lea.hbm %s2382_s0, %s1239_s26  ;;  %s281_s21 = scalar_lea.vmem [#allocation5], %s1205_s23 }
  0x22   : > { %s2405_s7 = scalar_select %p1894_p2, 1, 0 }
  0x23   : > { %s288_s24 = sshll.u32 %s281_s21, 4  ;;  %p1909_p4 = pnand %p1334_p1, %p1863_p3  ;;  %s1905_s24 = int_to_ptr.vmem [resolvable:$true] %s288_s24 }
  0x24   : > { %s1914_s15 = scalar_lea.sflag [#allocation6], %s277_s17  ;;  %s1586_s20 = scalar_lea.hbm %s1903_s8, 512 }
  0x25   : > { %p1587_p6 = scmp.ne.s32.totalorder %s1903_s8, %s1586_s20  ;;  %p1588_p8 = pneg %p1909_p4 }
  0x26   : > { %s1591_s22 = scalar_lea.hbm %s2382_s0, 1024  ;;  %p1592_p3 = scmp.lt.u32.totalorder %s1903_s8, %s2382_s0 }
  0x27   : > { %p1589_p9 = pnand %p1588_p8, %p1587_p6  ;;  %p1593_p11 = scmp.lt.u32.totalorder %s1591_s22, %s1586_s20 }
  0x28   : > { %p1595_p0 = scmp.lt.u32.totalorder %s1586_s20, %s1903_s8 }
  0x29   : > { %p1590_p10 = pneg %p1589_p9  ;;  %p1594_p13 = por %p1593_p11, %p1592_p3 }
  0x2b   : > { %p1596_p1 = por %p1595_p0, %p1594_p13 }
  0x2d   : > { %p1597_p5 = pnand %p1596_p1, %p1590_p10 }
  0x2f   : > { %1600 = shalt.err (!%p1597_p5)
}
  0x30   : > { %s1601_s17 = scalar_lea.vmem %s1905_s24, 512  ;;  %s1740_s23 = smov [#allocation5]  }
  0x31   : > { %p1602_p6 = scmp.ne.s32.totalorder %s1905_s24, %s1601_s17  ;;  %s1606_s26 = sshll.u32 %s1740_s23, 4  ;;  %s1607_s26 = int_to_ptr.vmem [resolvable:$false] %s1606_s26 }
  0x32   : > { %s1608_s27 = scalar_lea.vmem %s1607_s26, 1024  ;;  %p1609_p12 = scmp.lt.s32.totalorder %s1905_s24, %s1607_s26 }
  0x33   : > { %p1604_p9 = pnand %p1602_p6, %p1588_p8  ;;  %p1610_p3 = scmp.lt.s32.totalorder %s1608_s27, %s1601_s17 }
  0x35   : > { %p1605_p2 = pneg %p1604_p9  ;;  %p1611_p11 = por %p1610_p3, %p1609_p12 }
  0x37   : > { %p1612_p13 = pnand %p1611_p11, %p1605_p2 }
  0x39   : > { %1615 = shalt.err (!%p1612_p13)
}
  0x3a   : > { %s1741_s20 = smov 256   ;;  %s1742_s22 = smov 16  }
  0x3b   : > { %1329 = dma.hbm_to_vmem [thread:$0]  (!%p1909_p4), %s1903_s8, 512, %s1905_s24, %s1914_s15, %s1741_s20, %s1741_s20, %s1742_s22  }
  0x3c   : > { %p296_p5 = scmp.lt.s32.totalorder %s1738_s16, 5  ;;  %p2407_p8 = scmp.ge.s32.totalorder %s1738_s16, 1 }
  0x3e   : > { %p297_p10 = pnand %p2407_p8, %p296_p5 }
  0x3f   : > { %s302_s21 = sand.u32 (!%p297_p10), 1, %s1714_s11  }
  0x40   : > { %300 = sbr.rel (%p297_p10) target bundleno = 1321 (0x529), region = 52  ;;  %s1209_s17 = sshll.u32 (!%p297_p10), %s302_s21, 5 }
  0x41   : > { %s303_s23 = scalar_lea.sflag (!%p297_p10), [#allocation6], %s302_s21  ;;  %s1946_s26 = scalar_lea.vmem (!%p297_p10), [#allocation5], %s1209_s17 }
  0x47   : > { %1689 = dma.done.wait (%p1873_p7), %s303_s23, 512  }
  0x48   : > { %1691 = vsyncadd (%p1873_p7), %s303_s23, 4294966784  ;;  %s336_s8 = sand.u32 1, %s1702_s30   ;;  %s1211_s15 = sshll.u32 %s1722_s13, 7 }
  0x49   : > { %s1210_s24 = sshll.u32 %s336_s8, 4  ;;  %p1212_p12 = scmp.ne.s32.totalorder %s1722_s13, 0 }
  0x4a   : > { %s1956_s18 = scalar_lea.vmem [#allocation8], %s1210_s24  ;;  %v346_v0 = vld [vmem:[%s1946_s26 + $0x8] sm:$0xff] (!%p1212_p12)  ;;  %v348_v1 = vld [vmem:[%s1946_s26 + $0x18] sm:$0xff] (!%p1212_p12)  ;;  %v345_v2 = vld [vmem:[%s1946_s26] sm:$0xff] (!%p1212_p12)  ;;  %v1743_v5 = vmov (!%p1212_p12), 0   ;;  %vm358_vm0 = vcmask (!%p1212_p12), 130048  }
  0x4b   : > { %344 = sbr.rel (%p1212_p12) target bundleno = 492 (0x1ec), region = 60  ;;  %v350_v3 = vpack.c.bf16 (!%p1212_p12), %v348_v1, %v346_v0  ;;  %v347_v4 = vld [vmem:[%s1946_s26 + $0x10] sm:$0xff] (!%p1212_p12)  ;;  %394 = vmatprep.mubr.bf16.mxu0 (!%p1212_p12), %v1743_v5  ;;  %457 = vmatprep.mubr.bf16.mxu1 (!%p1212_p12), %v1743_v5  ;;  %v406_v9 = vld [vmem:[%s2388_s6 + $0x8] sm:$0xff] (!%p1212_p12)  ;;  %vm548_vm1 = vcmask (!%p1212_p12), 15360  }
  0x4c   : > { %v349_v6 = vpack.c.bf16 (!%p1212_p12), %v347_v4, %v345_v2  ;;  %1434 = vset.pattern.permute.xlu0 (!%p1212_p12), %v1743_v5  ;;  %v352_v7 = vld [vmem:[%s2387_s5] sm:$0x3] (!%p1212_p12)  ;;  %1435 = vset.pattern.permute.xlu1 (!%p1212_p12), %v1743_v5 }
  0x4d   : > { %362 = vmatprep.subr.bf16.mxu0 (!%p1212_p12), %v350_v3  ;;  %425 = vmatprep.subr.bf16.mxu1 (!%p1212_p12), %v350_v3  ;;  %v1518_v8 = vld [vmem:[%s2385_s3] sm:$0xff] (!%p1212_p12)  }
  0x4e   : > { %363 = vmatpush1.bf16.msra.mxu0 (!%p1212_p12), %v349_v6  ;;  %426 = vmatpush1.bf16.msra.mxu1 (!%p1212_p12), %v349_v6  ;;  %v351_v10 = vld [vmem:[%s2384_s2] sm:$0x1] (!%p1212_p12) }
  0x4f   : > { %355 = vperm.xlu0 (!%p1212_p12), %1434, %v352_v7   ;;  %414 = vperm.xlu1 (!%p1212_p12), %1435, %v406_v9   ;;  %v405_v11 = vld [vmem:[%s2388_s6] sm:$0xff] (!%p1212_p12) }
  0x51   : > { %1213 = vmatmul.mubr.msk.bf16.vlgmr.msra.gmra.mrb[0].mxu0 (!%p1212_p12), %vm358_vm0, %v351_v10  ;;  %1215 = vmatmul.mubr.msk.bf16.vlgmr.msra.gmra.mrb[0].mxu1 (!%p1212_p12), %vm358_vm0, %v1518_v8 }
  0x53   : > { %409 = vperm.xlu0 %1434, %v405_v11  }
  0xce   : > { %v356_v12 = vpop.permute.xlu0 %355  ;;  %v415_v14 = vpop.permute.xlu1 %414 }
  0xd2   : > { %v410_v13 = vpop.permute.xlu0 %409 }
 0x124   : > { %v396_v15 = vpop.f32.mrb[0].mxu0  ;;  %v459_v16 = vpop.f32.mrb[0].mxu1 }
 0x125   : > { %v397_v17 = vadd.f32 %v396_v15, %v356_v12  ;;  %v460_v18 = vadd.f32 %v459_v16, %v410_v13  ;;  %v398_v19 = vpop.f32.mrb[1].mxu0  ;;  %v461_v20 = vpop.f32.mrb[1].mxu1 }
 0x126   : > { %v399_v21 = vadd.f32 %v398_v19, %v356_v12  ;;  %v400_v22 = vpop.f32.mrb[2].mxu0  ;;  %v463_v23 = vpop.f32.mrb[2].mxu1  ;;  %v462_v28 = vadd.f32 %v461_v20, %v410_v13 }
 0x127   : > { %v464_v24 = vadd.f32 %v463_v23, %v415_v14  ;;  %v401_v25 = vpop.f32.mrb[3].mxu0  ;;  %v465_v26 = vpop.f32.mrb[3].mxu1 }
 0x128   : > { %v1436_v27 = vpack.i.bf16 %v399_v21, %v397_v17  ;;  %v466_v29 = vadd.f32 %v465_v26, %v415_v14 }
 0x129   : > { %v565_v30 = vpack.c.bf16 %v464_v24, %v460_v18 }
 0x12a   : > { %v566_v31 = vpack.c.bf16 %v466_v29, %v462_v28  ;;  %1437 = vxpose.xlu1.b32.start.end [1/1] (short) %v1436_v27, 128 }
 0x12b   : > { %567 = vst [vmem:[#allocation3] sm:$0xff] %v565_v30 }
 0x12c   : > { %568 = vst [vmem:[#allocation3 + $0x8] sm:$0xff] %v566_v31 }
 0x1aa   : > { %v1438_v32 = vpop.trf.xlu1 }
 0x1ab   : > { %v1442_v33 = vunpack.i.h.bf16 %v1438_v32  ;;  %v1439_v34 = vunpack.i.l.bf16 %v1438_v32 }
 0x1ae   : > { %v1443_v35 = vpop.trf.xlu1 }
 0x1af   : > { %v1447_v36 = vunpack.i.h.bf16 %v1443_v35  ;;  %v1444_v37 = vunpack.i.l.bf16 %v1443_v35 }
 0x1b1   : > { %v532_v38 = vpack.c.bf16 %v1444_v37, %v1439_v34  ;;  %v540_v39 = vpack.c.bf16 %v1447_v36, %v1442_v33 }
 0x1b2   : > { %v1448_v40 = vpop.trf.xlu1 }
 0x1b3   : > { %549 = vst.msk [vmem:[#allocation2] sm:$0xff] %vm548_vm1, %v532_v38  ;;  %557 = vst.msk [vmem:[#allocation2 + $0x40] sm:$0xff] %vm548_vm1, %v540_v39  ;;  %v1452_v41 = vunpack.i.h.bf16 %v1448_v40  ;;  %v1449_v42 = vunpack.i.l.bf16 %v1448_v40 }
 0x1b6   : > { %v1453_v43 = vpop.trf.xlu1 }
 0x1b7   : > { %v1457_v44 = vunpack.i.h.bf16 %v1453_v43  ;;  %v1454_v45 = vunpack.i.l.bf16 %v1453_v43 }
 0x1b9   : > { %v533_v46 = vpack.c.bf16 %v1454_v45, %v1449_v42  ;;  %v541_v47 = vpack.c.bf16 %v1457_v44, %v1452_v41 }
 0x1ba   : > { %v1458_v48 = vpop.trf.xlu1 }
 0x1bb   : > { %550 = vst.msk [vmem:[#allocation2 + $0x8] sm:$0xff] %vm548_vm1, %v533_v46  ;;  %558 = vst.msk [vmem:[#allocation2 + $0x48] sm:$0xff] %vm548_vm1, %v541_v47  ;;  %v1462_v49 = vunpack.i.h.bf16 %v1458_v48  ;;  %v1459_v50 = vunpack.i.l.bf16 %v1458_v48 }
 0x1be   : > { %v1463_v51 = vpop.trf.xlu1 }
 0x1bf   : > { %v1467_v52 = vunpack.i.h.bf16 %v1463_v51  ;;  %v1464_v53 = vunpack.i.l.bf16 %v1463_v51 }
 0x1c1   : > { %v534_v54 = vpack.c.bf16 %v1464_v53, %v1459_v50  ;;  %v542_v55 = vpack.c.bf16 %v1467_v52, %v1462_v49 }
 0x1c2   : > { %v1468_v56 = vpop.trf.xlu1 }
 0x1c3   : > { %551 = vst.msk [vmem:[#allocation2 + $0x10] sm:$0xff] %vm548_vm1, %v534_v54  ;;  %559 = vst.msk [vmem:[#allocation2 + $0x50] sm:$0xff] %vm548_vm1, %v542_v55  ;;  %v1472_v57 = vunpack.i.h.bf16 %v1468_v56  ;;  %v1469_v58 = vunpack.i.l.bf16 %v1468_v56 }
 0x1c6   : > { %v1473_v59 = vpop.trf.xlu1 }
 0x1c7   : > { %v1477_v60 = vunpack.i.h.bf16 %v1473_v59  ;;  %v1474_v61 = vunpack.i.l.bf16 %v1473_v59 }
 0x1c9   : > { %v535_v62 = vpack.c.bf16 %v1474_v61, %v1469_v58  ;;  %v543_v63 = vpack.c.bf16 %v1477_v60, %v1472_v57 }
 0x1ca   : > { %v1478_v0 = vpop.trf.xlu1 }
 0x1cb   : > { %552 = vst.msk [vmem:[#allocation2 + $0x18] sm:$0xff] %vm548_vm1, %v535_v62  ;;  %560 = vst.msk [vmem:[#allocation2 + $0x58] sm:$0xff] %vm548_vm1, %v543_v63  ;;  %v1482_v1 = vunpack.i.h.bf16 %v1478_v0  ;;  %v1479_v2 = vunpack.i.l.bf16 %v1478_v0 }
 0x1ce   : > { %v1483_v3 = vpop.trf.xlu1 }
 0x1cf   : > { %v1487_v4 = vunpack.i.h.bf16 %v1483_v3  ;;  %v1484_v5 = vunpack.i.l.bf16 %v1483_v3 }
 0x1d1   : > { %v536_v6 = vpack.c.bf16 %v1484_v5, %v1479_v2  ;;  %v544_v7 = vpack.c.bf16 %v1487_v4, %v1482_v1 }
 0x1d2   : > { %v1488_v8 = vpop.trf.xlu1 }
 0x1d3   : > { %553 = vst.msk [vmem:[#allocation2 + $0x20] sm:$0xff] %vm548_vm1, %v536_v6  ;;  %561 = vst.msk [vmem:[#allocation2 + $0x60] sm:$0xff] %vm548_vm1, %v544_v7  ;;  %v1492_v9 = vunpack.i.h.bf16 %v1488_v8  ;;  %v1489_v10 = vunpack.i.l.bf16 %v1488_v8 }
 0x1d6   : > { %v1493_v11 = vpop.trf.xlu1 }
 0x1d7   : > { %v1497_v12 = vunpack.i.h.bf16 %v1493_v11  ;;  %v1494_v13 = vunpack.i.l.bf16 %v1493_v11 }
 0x1d9   : > { %v537_v14 = vpack.c.bf16 %v1494_v13, %v1489_v10  ;;  %v545_v15 = vpack.c.bf16 %v1497_v12, %v1492_v9 }
 0x1da   : > { %v1498_v16 = vpop.trf.xlu1 }
 0x1db   : > { %554 = vst.msk [vmem:[#allocation2 + $0x28] sm:$0xff] %vm548_vm1, %v537_v14  ;;  %562 = vst.msk [vmem:[#allocation2 + $0x68] sm:$0xff] %vm548_vm1, %v545_v15  ;;  %v1502_v17 = vunpack.i.h.bf16 %v1498_v16  ;;  %v1499_v18 = vunpack.i.l.bf16 %v1498_v16 }
 0x1de   : > { %v1503_v19 = vpop.trf.xlu1 }
 0x1df   : > { %v1507_v20 = vunpack.i.h.bf16 %v1503_v19  ;;  %v1504_v21 = vunpack.i.l.bf16 %v1503_v19 }
 0x1e1   : > { %v538_v22 = vpack.c.bf16 %v1504_v21, %v1499_v18  ;;  %v546_v23 = vpack.c.bf16 %v1507_v20, %v1502_v17 }
 0x1e2   : > { %v1508_v24 = vpop.trf.xlu1 }
 0x1e3   : > { %555 = vst.msk [vmem:[#allocation2 + $0x30] sm:$0xff] %vm548_vm1, %v538_v22  ;;  %563 = vst.msk [vmem:[#allocation2 + $0x70] sm:$0xff] %vm548_vm1, %v546_v23  ;;  %v1512_v25 = vunpack.i.h.bf16 %v1508_v24  ;;  %v1509_v26 = vunpack.i.l.bf16 %v1508_v24 }
 0x1e6   : > { %v1513_v27 = vpop.trf.xlu1 }
 0x1e7   : > { %v1517_v28 = vunpack.i.h.bf16 %v1513_v27  ;;  %v1514_v29 = vunpack.i.l.bf16 %v1513_v27 }
 0x1e9   : > { %v539_v30 = vpack.c.bf16 %v1514_v29, %v1509_v26  ;;  %v547_v31 = vpack.c.bf16 %v1517_v28, %v1512_v25 }
 0x1eb   : > { %556 = vst.msk [vmem:[#allocation2 + $0x38] sm:$0xff] %vm548_vm1, %v539_v30  ;;  %564 = vst.msk [vmem:[#allocation2 + $0x78] sm:$0xff] %vm548_vm1, %v547_v31 }
 0x1ec PF: > { %s569_s20 = sshra.s32 %s1211_s15, 7  ;;  %v1744_v32 = vmov 0.0   ;;  %vm1745_vm2 = vmmov 0   ;;  %v577_v33 = vld [vmem:[%s2386_s4] sm:$0x3]  ;;  %v1746_v34 = vmov 0  }
 0x1ed   : > { %1281 = vmatprep.subr.bf16.mxu0 %v1744_v32  ;;  %s1216_s22 = sshll.u32 %s569_s20, 3  ;;  %1283 = vmatprep.mubr.msk.bf16.mxu0 %vm1745_vm2, %v1744_v32  ;;  %v575_v38 = vld [vmem:[%s2383_s1] sm:$0x1]  ;;  %vm583_vm3 = vcmask 130048   ;;  %vm644_vm4 = vcmask 15360   ;;  %vm693_vm5 = vcmask 1040384  }
 0x1ee   : > { %s572_s23 = scalar_lea.vmem %s1946_s26, %s1216_s22 [#allocation5]  ;;  %1519 = vset.pattern.permute.xlu0 %v1746_v34  ;;  %v627_v39 = vld [vmem:[#allocation2] sm:$0xff]  ;;  %v628_v48 = vld [vmem:[#allocation2 + $0x8] sm:$0xff]  ;;  %v629_v49 = vld [vmem:[#allocation2 + $0x10] sm:$0xff]  ;;  %s1090_s26 = sld [smem:[#allocation4]] }
 0x1ef   : > { %v2000_v35 = vld [vmem:[%s572_s23] sm:$0xff]  ;;  %v2002_v36 = vld [vmem:[%s572_s23 + $0x10] sm:$0xff]  ;;  %580 = vperm.xlu0 %1519, %v577_v33   ;;  %1289 = vmatprep.mubr.msk.bf16.mxu1 %vm644_vm4, %v627_v39  ;;  %v630_v50 = vld [vmem:[#allocation2 + $0x18] sm:$0xff]  ;;  %s1235_s25 = sshll.u32 %s1726_s14, 2  ;;  %s1113_s20 = sshll.u32 %s1956_s18, 4  ;;  %s2309_s20 = int_to_ptr.vmem [resolvable:$true] %s1113_s20 }
 0x1f0   : > { %v576_v37 = vpack.c.bf16 %v2002_v36, %v2000_v35  ;;  %v631_v51 = vld [vmem:[#allocation2 + $0x20] sm:$0xff]  ;;  %v632_v52 = vld [vmem:[#allocation2 + $0x28] sm:$0xff]  ;;  %v633_v53 = vld [vmem:[#allocation2 + $0x30] sm:$0xff]  ;;  %s1110_s27 = sadd.s32 %s1722_s13, %s1235_s25  ;;  %s2408_s17 = sld [smem:[#allocation15_spill]] }
 0x1f1   : > { %v635_v55 = vld [vmem:[#allocation2 + $0x40] sm:$0xff]  ;;  %v636_v56 = vld [vmem:[#allocation2 + $0x48] sm:$0xff]  ;;  %v637_v57 = vld [vmem:[#allocation2 + $0x50] sm:$0xff]  ;;  %s1236_s22 = sshll.u32 %s1110_s27, 7  ;;  %s2321_s13 = scalar_lea.sflag [#allocation7], %s336_s8 }
 0x1f2   : > { %1282 = vmatpush3.bf16.msra.mxu0 %v576_v37  ;;  %v634_v54 = vld [vmem:[#allocation2 + $0x38] sm:$0xff]  ;;  %v639_v59 = vld [vmem:[#allocation2 + $0x60] sm:$0xff]  ;;  %v640_v60 = vld [vmem:[#allocation2 + $0x68] sm:$0xff]  ;;  %s1616_s15 = scalar_lea.vmem %s2309_s20, 256  ;;  %p2409_p2 = scmp.ne.s32.totalorder %s2404_s28, 0 }
 0x1f3   : > { %v638_v58 = vld [vmem:[#allocation2 + $0x58] sm:$0xff]  ;;  %v641_v61 = vld [vmem:[#allocation2 + $0x70] sm:$0xff]  ;;  %v1029_v32 = vld [vmem:[#allocation3 + $0x8] sm:$0xff]  ;;  %p1617_p7 = scmp.ne.s32.totalorder %s2309_s20, %s1616_s15  ;;  %s1747_s24 = smov [#allocation8]  }
 0x1f4   : > { %v642_v62 = vld [vmem:[#allocation2 + $0x78] sm:$0xff] }
 0x1f5   : > { %1284 = vmatmul.mubr.msk.bf16.vlgmr.msra.gmra.mrb[0].mxu0 %vm583_vm3, %v575_v38  ;;  %p1618_p4 = pnand %p1617_p7, %p2409_p2 }
 0x1f6   : > { %1078 = vmatprep.mubr.bf16.mxu0 %v1029_v32  ;;  %s2314_s23 = scalar_lea.hbm %s2408_s17, %s1236_s22 }
 0x1f7   : > { %p1619_p0 = pneg %p1618_p4 }
 0x26e   : > { %v581_v40 = vpop.permute.xlu0 %580 }
 0x2c8   : > { %v621_v41 = vpop.f32.mrb[0].mxu0 }
 0x2c9   : > { %v622_v42 = vadd.f32 %v621_v41, %v581_v40  ;;  %v1285_v43 = vpop.f32.mrb[1].mxu0 }
 0x2ca   : > { %v624_v44 = vpop.f32.mrb[2].mxu0 }
 0x2cb   : > { %v643_v45 = vpack.c.bf16 %v622_v42, %v622_v42  ;;  %v1286_v46 = vpop.f32.mrb[3].mxu0 }
 0x2cd   : > { %1321 = vmatprep.subr.msk.bf16.mxu1 %vm693_vm5, %v643_v45  ;;  %v695_v47 = vsel %vm693_vm5, %v643_v45, 0 }
 0x2ce   : > { %1288 = vmatpush3.bf16.msra.mxu1 %v695_v47 }
 0x2d1   : > { %1290 = vmatmul.mubr.msk.bf16.vlgmr.msra.gmra.mrb[0].mxu1 %vm644_vm4, %v628_v48 }
 0x2d2   : > { %1293 = vmatprep.mubr.msk.bf16.mxu1 %vm644_vm4, %v629_v49 }
 0x2d9   : > { %1294 = vmatmul.mubr.msk.bf16.gmra.mrb[4].mxu1 %vm644_vm4, %v630_v50 }
 0x2da   : > { %1297 = vmatprep.mubr.msk.bf16.mxu1 %vm644_vm4, %v631_v51 }
 0x2e1   : > { %1298 = vmatmul.mubr.msk.bf16.gmra.mrb[8].mxu1 %vm644_vm4, %v632_v52 }
 0x2e2   : > { %1301 = vmatprep.mubr.msk.bf16.mxu1 %vm644_vm4, %v633_v53 }
 0x2e9   : > { %1302 = vmatmul.mubr.msk.bf16.gmra.mrb[12].mxu1 %vm644_vm4, %v634_v54 }
 0x2ea   : > { %1305 = vmatprep.mubr.msk.bf16.mxu1 %vm644_vm4, %v635_v55 }
 0x2f1   : > { %1306 = vmatmul.mubr.msk.bf16.gmra.mrb[16].mxu1 %vm644_vm4, %v636_v56 }
 0x2f2   : > { %1309 = vmatprep.mubr.msk.bf16.mxu1 %vm644_vm4, %v637_v57 }
 0x2f9   : > { %1310 = vmatmul.mubr.msk.bf16.gmra.mrb[20].mxu1 %vm644_vm4, %v638_v58 }
 0x2fa   : > { %1313 = vmatprep.mubr.msk.bf16.mxu1 %vm644_vm4, %v639_v59 }
 0x301   : > { %1314 = vmatmul.mubr.msk.bf16.gmra.mrb[24].mxu1 %vm644_vm4, %v640_v60 }
 0x302   : > { %1317 = vmatprep.mubr.msk.bf16.mxu1 %vm644_vm4, %v641_v61 }
 0x309   : > { %1318 = vmatmul.mubr.msk.bf16.gmra.mrb[28].mxu1 %vm644_vm4, %v642_v62 }
 0x3a4   : > { %v2025_v63 = vpop.f32.mrb[0].mxu1 }
 0x3a5   : > { %v2027_v0 = vpop.f32.mrb[1].mxu1 }
 0x3a6   : > { %v2029_v1 = vpop.f32.mrb[2].mxu1 }
 0x3a7   : > { %v2031_v2 = vpop.f32.mrb[3].mxu1 }
 0x3ac   : > { %v2033_v3 = vpop.f32.mrb[4].mxu1 }
 0x3ad   : > { %v860_v4 = vmax.f32 %v2025_v63, %v2033_v3  ;;  %v2037_v5 = vpop.f32.mrb[5].mxu1 }
 0x3ae   : > { %v858_v6 = vmax.f32 %v2027_v0, %v2037_v5  ;;  %v2041_v7 = vpop.f32.mrb[6].mxu1 }
 0x3af   : > { %v861_v8 = vmax.f32 %v2029_v1, %v2041_v7  ;;  %v2045_v9 = vpop.f32.mrb[7].mxu1 }
 0x3b0   : > { %v859_v10 = vmax.f32 %v2031_v2, %v2045_v9 }
 0x3b4   : > { %v2049_v11 = vpop.f32.mrb[8].mxu1 }
 0x3b5   : > { %v864_v12 = vmax.f32 %v860_v4, %v2049_v11  ;;  %v2052_v13 = vpop.f32.mrb[9].mxu1 }
 0x3b6   : > { %v862_v14 = vmax.f32 %v858_v6, %v2052_v13  ;;  %v2055_v15 = vpop.f32.mrb[10].mxu1 }
 0x3b7   : > { %v865_v16 = vmax.f32 %v861_v8, %v2055_v15  ;;  %v2058_v17 = vpop.f32.mrb[11].mxu1 }
 0x3b8   : > { %v863_v18 = vmax.f32 %v859_v10, %v2058_v17 }
 0x3bc   : > { %v2061_v19 = vpop.f32.mrb[12].mxu1 }
 0x3bd   : > { %v868_v20 = vmax.f32 %v864_v12, %v2061_v19  ;;  %v2064_v21 = vpop.f32.mrb[13].mxu1 }
 0x3be   : > { %v866_v22 = vmax.f32 %v862_v14, %v2064_v21  ;;  %v2067_v23 = vpop.f32.mrb[14].mxu1 }
 0x3bf   : > { %v869_v24 = vmax.f32 %v865_v16, %v2067_v23  ;;  %v2070_v25 = vpop.f32.mrb[15].mxu1 }
 0x3c0   : > { %v867_v26 = vmax.f32 %v863_v18, %v2070_v25 }
 0x3c4   : > { %v2073_v27 = vpop.f32.mrb[16].mxu1 }
 0x3c5   : > { %v872_v28 = vmax.f32 %v868_v20, %v2073_v27  ;;  %v2076_v29 = vpop.f32.mrb[17].mxu1 }
 0x3c6   : > { %v870_v30 = vmax.f32 %v866_v22, %v2076_v29  ;;  %v2079_v31 = vpop.f32.mrb[18].mxu1 }
 0x3c7   : > { %v873_v33 = vmax.f32 %v869_v24, %v2079_v31  ;;  %v2082_v34 = vpop.f32.mrb[19].mxu1 }
 0x3c8   : > { %v871_v37 = vmax.f32 %v867_v26, %v2082_v34 }
 0x3cc   : > { %v2085_v38 = vpop.f32.mrb[20].mxu1 }
 0x3cd   : > { %v876_v39 = vmax.f32 %v872_v28, %v2085_v38  ;;  %v2088_v40 = vpop.f32.mrb[21].mxu1 }
 0x3ce   : > { %v874_v41 = vmax.f32 %v870_v30, %v2088_v40  ;;  %v2091_v42 = vpop.f32.mrb[22].mxu1 }
 0x3cf   : > { %v877_v43 = vmax.f32 %v873_v33, %v2091_v42  ;;  %v2094_v44 = vpop.f32.mrb[23].mxu1 }
 0x3d0   : > { %v875_v45 = vmax.f32 %v871_v37, %v2094_v44 }
 0x3d4   : > { %v2097_v46 = vpop.f32.mrb[24].mxu1 }
 0x3d5   : > { %v880_v47 = vmax.f32 %v876_v39, %v2097_v46  ;;  %v2100_v48 = vpop.f32.mrb[25].mxu1 }
 0x3d6   : > { %v878_v49 = vmax.f32 %v874_v41, %v2100_v48  ;;  %v2103_v50 = vpop.f32.mrb[26].mxu1 }
 0x3d7   : > { %v881_v51 = vmax.f32 %v877_v43, %v2103_v50  ;;  %v2106_v52 = vpop.f32.mrb[27].mxu1 }
 0x3d8   : > { %v879_v53 = vmax.f32 %v875_v45, %v2106_v52 }
 0x3dc   : > { %v2109_v54 = vpop.f32.mrb[28].mxu1 }
 0x3dd   : > { %v884_v55 = vmax.f32 %v880_v47, %v2109_v54  ;;  %v2112_v56 = vpop.f32.mrb[29].mxu1 }
 0x3de   : > { %v882_v57 = vmax.f32 %v878_v49, %v2112_v56  ;;  %v2115_v58 = vpop.f32.mrb[30].mxu1 }
 0x3df   : > { %v885_v59 = vmax.f32 %v881_v51, %v2115_v58  ;;  %v2118_v60 = vpop.f32.mrb[31].mxu1 }
 0x3e0   : > { %v883_v61 = vmax.f32 %v879_v53, %v2118_v60 }
 0x3e1   : > { %v887_v62 = vmax.f32 %v884_v55, %v885_v59 }
 0x3e2   : > { %v886_v4 = vmax.f32 %v882_v57, %v883_v61 }
 0x3e4   : > { %v888_v6 = vmax.f32 %v886_v4, %v887_v62 }
 0x3e6   : > { %v889_v8 = vrot.slane %v888_v6, 4 }
 0x3e8   : > { %v890_v10 = vmax.f32 %v888_v6, %v889_v8 }
 0x3ea   : > { %v891_v12 = vrot.slane %v890_v10, 2 }
 0x3ec   : > { %v892_v14 = vmax.f32 %v890_v10, %v891_v12 }
 0x3ee   : > { %v893_v16 = vrot.slane %v892_v14, 1 }
 0x3f0   : > { %v2121_v18 = vmax.f32 %v892_v14, %v893_v16 }
 0x3f2   : > { %v895_v20 = vsub.f32 %v2027_v0, %v2121_v18  ;;  %v896_v22 = vsub.f32 %v2031_v2, %v2121_v18  ;;  %v897_v24 = vsub.f32 %v2025_v63, %v2121_v18  ;;  %v898_v26 = vsub.f32 %v2029_v1, %v2121_v18 }
 0x3f3   : > { %v899_v28 = vsub.f32 %v2037_v5, %v2121_v18  ;;  %v900_v30 = vsub.f32 %v2045_v9, %v2121_v18  ;;  %v901_v32 = vsub.f32 %v2033_v3, %v2121_v18  ;;  %v902_v0 = vsub.f32 %v2041_v7, %v2121_v18 }
 0x3f4   : > { %v903_v2 = vsub.f32 %v2052_v13, %v2121_v18  ;;  %v904_v63 = vsub.f32 %v2058_v17, %v2121_v18  ;;  %v905_v1 = vsub.f32 %v2049_v11, %v2121_v18  ;;  %v906_v5 = vsub.f32 %v2055_v15, %v2121_v18 }
 0x3f5   : > { %v907_v9 = vsub.f32 %v2064_v21, %v2121_v18  ;;  %v908_v3 = vsub.f32 %v2070_v25, %v2121_v18  ;;  %v909_v7 = vsub.f32 %v2061_v19, %v2121_v18  ;;  %v910_v13 = vsub.f32 %v2067_v23, %v2121_v18 }
 0x3f6   : > { %v911_v17 = vsub.f32 %v2076_v29, %v2121_v18  ;;  %v912_v11 = vsub.f32 %v2082_v34, %v2121_v18  ;;  %v913_v15 = vsub.f32 %v2073_v27, %v2121_v18  ;;  %v914_v21 = vsub.f32 %v2079_v31, %v2121_v18 }
 0x3f7   : > { %v915_v25 = vsub.f32 %v2088_v40, %v2121_v18  ;;  %v916_v19 = vsub.f32 %v2094_v44, %v2121_v18  ;;  %v917_v23 = vsub.f32 %v2085_v38, %v2121_v18  ;;  %v918_v29 = vsub.f32 %v2091_v42, %v2121_v18 }
 0x3f8   : > { %v919_v33 = vsub.f32 %v2100_v48, %v2121_v18  ;;  %v920_v27 = vsub.f32 %v2106_v52, %v2121_v18  ;;  %v921_v31 = vsub.f32 %v2097_v46, %v2121_v18  ;;  %v922_v34 = vsub.f32 %v2103_v50, %v2121_v18 }
 0x3f9   : > { %v923_v37 = vsub.f32 %v2112_v56, %v2121_v18  ;;  %v924_v39 = vsub.f32 %v2118_v60, %v2121_v18  ;;  %v925_v40 = vsub.f32 %v2109_v54, %v2121_v18  ;;  %v926_v41 = vsub.f32 %v2115_v58, %v2121_v18 }
 0x3fa   : > { %v927_v43 = vmul.f32 1.442695, %v895_v20  ;;  %v929_v45 = vmul.f32 1.442695, %v896_v22  ;;  %v931_v47 = vmul.f32 1.442695, %v897_v24 }
 0x3fb   : > { %v933_v49 = vmul.f32 1.442695, %v898_v26  ;;  %v935_v51 = vmul.f32 1.442695, %v899_v28  ;;  %v937_v53 = vmul.f32 1.442695, %v900_v30 }
 0x3fc   : > { %1520 = vpow2.f32 %v927_v43  ;;  %v939_v55 = vmul.f32 1.442695, %v901_v32  ;;  %v941_v57 = vmul.f32 1.442695, %v902_v0  ;;  %v943_v59 = vmul.f32 1.442695, %v903_v2 }
 0x3fd   : > { %1522 = vpow2.f32 %v929_v45  ;;  %v945_v61 = vmul.f32 1.442695, %v904_v63  ;;  %v947_v62 = vmul.f32 1.442695, %v905_v1  ;;  %v949_v4 = vmul.f32 1.442695, %v906_v5 }
 0x3fe   : > { %1524 = vpow2.f32 %v931_v47  ;;  %v951_v6 = vmul.f32 1.442695, %v907_v9  ;;  %v953_v8 = vmul.f32 1.442695, %v908_v3  ;;  %v955_v12 = vmul.f32 1.442695, %v909_v7 }
 0x3ff   : > { %1526 = vpow2.f32 %v933_v49  ;;  %v957_v16 = vmul.f32 1.442695, %v910_v13  ;;  %v959_v22 = vmul.f32 1.442695, %v911_v17  ;;  %v961_v30 = vmul.f32 1.442695, %v912_v11 }
 0x400   : > { %1528 = vpow2.f32 %v935_v51  ;;  %v963_v0 = vmul.f32 1.442695, %v913_v15  ;;  %v965_v5 = vmul.f32 1.442695, %v914_v21  ;;  %v967_v3 = vmul.f32 1.442695, %v915_v25 }
 0x401   : > { %1530 = vpow2.f32 %v937_v53  ;;  %v969_v11 = vmul.f32 1.442695, %v916_v19  ;;  %v971_v21 = vmul.f32 1.442695, %v917_v23  ;;  %v973_v44 = vmul.f32 1.442695, %v918_v29 }
 0x402   : > { %1532 = vpow2.f32 %v939_v55  ;;  %v975_v38 = vmul.f32 1.442695, %v919_v33  ;;  %v977_v42 = vmul.f32 1.442695, %v920_v27  ;;  %v979_v48 = vmul.f32 1.442695, %v921_v31 }
 0x403   : > { %1534 = vpow2.f32 %v941_v57  ;;  %v981_v52 = vmul.f32 1.442695, %v922_v34  ;;  %v983_v46 = vmul.f32 1.442695, %v923_v37  ;;  %v985_v50 = vmul.f32 1.442695, %v924_v39 }
 0x404   : > { %1536 = vpow2.f32 %v943_v59  ;;  %v987_v59 = vmul.f32 1.442695, %v925_v40 }
 0x405   : > { %1538 = vpow2.f32 %v945_v61 }
 0x406   : > { %v2187_v10 = vpop.eup %1520  ;;  %1540 = vpow2.f32 %v947_v62  ;;  %v989_v62 = vmul.f32 1.442695, %v926_v41 }
 0x407   : > { %v2189_v14 = vpop.eup %1522  ;;  %1542 = vpow2.f32 %v949_v4 }
 0x408   : > { %v2191_v20 = vpop.eup %1524  ;;  %1544 = vpow2.f32 %v951_v6  ;;  %v991_v24 = vadd.f32 %v2189_v14, %v2187_v10  ;;  %v1030_v26 = vpack.c.bf16 %v2189_v14, %v2187_v10 }
 0x409   : > { %v2197_v28 = vpop.eup %1526  ;;  %1546 = vpow2.f32 %v953_v8 }
 0x40a   : > { %v2199_v32 = vpop.eup %1528  ;;  %1548 = vpow2.f32 %v955_v12  ;;  %v992_v2 = vadd.f32 %v2191_v20, %v991_v24  ;;  %v1031_v63 = vpack.c.bf16 %v2197_v28, %v2191_v20 }
 0x40b   : > { %v2204_v1 = vpop.eup %1530  ;;  %1550 = vpow2.f32 %v957_v16 }
 0x40c   : > { %v2206_v9 = vpop.eup %1532  ;;  %1552 = vpow2.f32 %v959_v22  ;;  %v993_v7 = vadd.f32 %v2197_v28, %v992_v2  ;;  %v1032_v13 = vpack.c.bf16 %v2204_v1, %v2199_v32 }
 0x40d   : > { %v2211_v17 = vpop.eup %1534  ;;  %1554 = vpow2.f32 %v961_v30 }
 0x40e   : > { %v2216_v15 = vpop.eup %1536  ;;  %1556 = vpow2.f32 %v963_v0  ;;  %v994_v25 = vadd.f32 %v2199_v32, %v993_v7  ;;  %v1033_v43 = vpack.c.bf16 %v2211_v17, %v2206_v9 }
 0x40f   : > { %v2224_v45 = vpop.eup %1538  ;;  %1558 = vpow2.f32 %v965_v5 }
 0x410   : > { %v2229_v19 = vpop.eup %1540  ;;  %1560 = vpow2.f32 %v967_v3  ;;  %v995_v23 = vadd.f32 %v2204_v1, %v994_v25  ;;  %v1034_v47 = vpack.c.bf16 %v2224_v45, %v2216_v15 }
 0x411   : > { %v2237_v49 = vpop.eup %1542  ;;  %1562 = vpow2.f32 %v969_v11 }
 0x412   : > { %v2242_v29 = vpop.eup %1544  ;;  %1564 = vpow2.f32 %v971_v21  ;;  %v996_v33 = vadd.f32 %v2206_v9, %v995_v23  ;;  %v1035_v51 = vpack.c.bf16 %v2237_v49, %v2229_v19 }
 0x413   : > { %v2250_v53 = vpop.eup %1546  ;;  %1566 = vpow2.f32 %v973_v44 }
 0x414   : > { %v2255_v27 = vpop.eup %1548  ;;  %1568 = vpow2.f32 %v975_v38  ;;  %v997_v31 = vadd.f32 %v2211_v17, %v996_v33  ;;  %v1036_v55 = vpack.c.bf16 %v2250_v53, %v2242_v29 }
 0x415   : > { %v2263_v57 = vpop.eup %1550  ;;  %1570 = vpow2.f32 %v977_v42 }
 0x416   : > { %v1553_v34 = vpop.eup %1552  ;;  %1572 = vpow2.f32 %v979_v48  ;;  %v998_v56 = vadd.f32 %v2216_v15, %v997_v31  ;;  %v1037_v37 = vpack.c.bf16 %v2263_v57, %v2255_v27  ;;  %v1028_v15 = vld [vmem:[#allocation3] sm:$0xff] }
 0x417   : > { %v1555_v61 = vpop.eup %1554  ;;  %1574 = vpow2.f32 %v981_v52 }
 0x418   : > { %v1557_v4 = vpop.eup %1556  ;;  %1576 = vpow2.f32 %v983_v46  ;;  %v999_v60 = vadd.f32 %v2224_v45, %v998_v56  ;;  %v1038_v39 = vpack.c.bf16 %v1555_v61, %v1553_v34 }
 0x419   : > { %v1559_v6 = vpop.eup %1558  ;;  %1578 = vpow2.f32 %v985_v50 }
 0x41a   : > { %v1561_v54 = vpop.eup %1560  ;;  %1580 = vpow2.f32 %v987_v59  ;;  %v1000_v40 = vadd.f32 %v2229_v19, %v999_v60  ;;  %1259 = vmatprep.subr.bf16.mxu0 %v1038_v39  ;;  %v1039_v8 = vpack.c.bf16 %v1559_v6, %v1557_v4  ;;  %v1091_v59 = vstv %s1090_s26  ;;  %s1620_s26 = sshll.u32 %s1747_s24, 4  ;;  %s1621_s26 = int_to_ptr.vmem [resolvable:$false] %s1620_s26 }
 0x41b   : > { %v1563_v12 = vpop.eup %1562  ;;  %1582 = vpow2.f32 %v989_v62  ;;  %1260 = vmatpush3.bf16.msra.mxu0 %v1030_v26  ;;  %s1622_s25 = scalar_lea.vmem %s1621_s26, 512  ;;  %p1623_p1 = scmp.lt.s32.totalorder %s2309_s20, %s1621_s26 }
 0x41c   : > { %v1565_v58 = vpop.eup %1564  ;;  %v1001_v18 = vadd.f32 %v2237_v49, %v1000_v40  ;;  %1261 = vmatprep.subr.bf16.mxu0 %v1039_v8  ;;  %v1040_v41 = vpack.c.bf16 %v1563_v12, %v1561_v54  ;;  %p1624_p6 = scmp.lt.s32.totalorder %s1622_s25, %s1616_s15 }
 0x41d   : > { %v1567_v16 = vpop.eup %1566 }
 0x41e   : > { %v1569_v22 = vpop.eup %1568  ;;  %v1002_v24 = vadd.f32 %v2242_v29, %v1001_v18  ;;  %v1041_v30 = vpack.c.bf16 %v1567_v16, %v1565_v58  ;;  %p1625_p9 = por %p1624_p6, %p1623_p1 }
 0x41f   : > { %v1571_v0 = vpop.eup %1570  ;;  %1262 = vmatpush3.bf16.msra.mxu0 %v1031_v63 }
 0x420   : > { %v1573_v2 = vpop.eup %1572  ;;  %v1003_v5 = vadd.f32 %v2250_v53, %v1002_v24  ;;  %1263 = vmatprep.subr.bf16.mxu0 %v1040_v41  ;;  %v1042_v10 = vpack.c.bf16 %v1571_v0, %v1569_v22  ;;  %p1626_p3 = pnand %p1625_p9, %p1619_p0 }
 0x421   : > { %v1575_v14 = vpop.eup %1574 }
 0x422   : > { %v1577_v26 = vpop.eup %1576  ;;  %v1004_v3 = vadd.f32 %v2255_v27, %v1003_v5  ;;  %v1043_v7 = vpack.c.bf16 %v1575_v14, %v1573_v2 }
 0x423   : > { %v1579_v11 = vpop.eup %1578  ;;  %1264 = vmatpush3.bf16.msra.mxu0 %v1032_v13 }
 0x424   : > { %v1581_v21 = vpop.eup %1580  ;;  %v1005_v25 = vadd.f32 %v2263_v57, %v1004_v3  ;;  %1265 = vmatprep.subr.bf16.mxu0 %v1041_v30  ;;  %v1044_v20 = vpack.c.bf16 %v1579_v11, %v1577_v26 }
 0x425   : > { %v1583_v28 = vpop.eup %1582 }
 0x426   : > { %v1006_v63 = vadd.f32 %v1553_v34, %v1005_v25  ;;  %v1045_v44 = vpack.c.bf16 %v1583_v28, %v1581_v21 }
 0x427   : > { %1266 = vmatpush3.bf16.msra.mxu0 %v1033_v43 }
 0x428   : > { %v1007_v38 = vadd.f32 %v1555_v61, %v1006_v63  ;;  %1267 = vmatprep.subr.bf16.mxu0 %v1042_v10 }
 0x42a   : > { %v1008_v23 = vadd.f32 %v1557_v4, %v1007_v38 }
 0x42b   : > { %1268 = vmatpush3.bf16.msra.mxu0 %v1034_v47 }
 0x42c   : > { %v1009_v32 = vadd.f32 %v1559_v6, %v1008_v23  ;;  %1269 = vmatprep.subr.bf16.mxu0 %v1043_v7 }
 0x42e   : > { %v1010_v1 = vadd.f32 %v1561_v54, %v1009_v32 }
 0x42f   : > { %1270 = vmatpush3.bf16.msra.mxu0 %v1035_v51 }
 0x430   : > { %v1011_v13 = vadd.f32 %v1563_v12, %v1010_v1  ;;  %1271 = vmatprep.subr.bf16.mxu0 %v1044_v20 }
 0x432   : > { %v1012_v42 = vadd.f32 %v1565_v58, %v1011_v13 }
 0x433   : > { %1272 = vmatpush3.bf16.msra.mxu0 %v1036_v55 }
 0x434   : > { %v1013_v9 = vadd.f32 %v1567_v16, %v1012_v42  ;;  %1273 = vmatprep.subr.bf16.mxu0 %v1045_v44 }
 0x436   : > { %v1014_v17 = vadd.f32 %v1569_v22, %v1013_v9 }
 0x437   : > { %1274 = vmatpush3.bf16.msra.mxu0 %v1037_v37 }
 0x438   : > { %v1015_v43 = vadd.f32 %v1571_v0, %v1014_v17 }
 0x43a   : > { %v1016_v45 = vadd.f32 %v1573_v2, %v1015_v43  ;;  %1079 = vmatmul.mubr.bf16.vlgmr.msra.gmra.mrb[4].mxu0 %v1028_v15 }
 0x43c   : > { %v1017_v47 = vadd.f32 %v1575_v14, %v1016_v45 }
 0x43e   : > { %v1018_v48 = vadd.f32 %v1577_v26, %v1017_v47 }
 0x440   : > { %v1019_v19 = vadd.f32 %v1579_v11, %v1018_v48 }
 0x442   : > { %v1020_v49 = vadd.f32 %v1581_v21, %v1019_v19 }
 0x444   : > { %v1021_v33 = vadd.f32 %v1583_v28, %v1020_v49 }
 0x446   : > { %v1022_v51 = vrot.slane %v1021_v33, 4 }
 0x448   : > { %v1023_v52 = vadd.f32 %v1022_v51, %v1021_v33 }
 0x44a   : > { %v1024_v27 = vrot.slane %v1023_v52, 2 }
 0x44c   : > { %v1025_v29 = vadd.f32 %v1024_v27, %v1023_v52 }
 0x44e   : > { %v1026_v53 = vrot.slane %v1025_v29, 1 }
 0x450   : > { %v1027_v46 = vadd.f32 %v1026_v53, %v1025_v29 }
 0x452   : > { %1584 = vrcp.f32 %v1027_v46 }
 0x45c   : > { %v1585_v34 = vpop.eup %1584 }
 0x50d   : > { %v1275_v31 = vpop.f32.mrb[4].mxu0 }
 0x50e   : > { %v1276_v55 = vpop.f32.mrb[5].mxu0 }
 0x50f   : > { %v1277_v57 = vadd.f32 %v1276_v55, %v1275_v31  ;;  %v1278_v50 = vpop.f32.mrb[6].mxu0 }
 0x510   : > { %v1279_v56 = vpop.f32.mrb[7].mxu0 }
 0x511   : > { %v1088_v37 = vmul.f32 %v1585_v34, %v1277_v57  ;;  %v1280_v61 = vadd.f32 %v1279_v56, %v1278_v50 }
 0x513   : > { %v1092_v62 = vmul.f32 %v1091_v59, %v1088_v37  ;;  %v1089_v4 = vmul.f32 %v1585_v34, %v1280_v61 }
 0x515   : > { %v1094_v60 = vadd.f32 %v1092_v62, %v2000_v35  ;;  %v1093_v39 = vmul.f32 %v1091_v59, %v1089_v4 }
 0x517   : > { %1096 = vst [vmem:[%s1956_s18] sm:$0xff] %v1094_v60  ;;  %v1095_v6 = vadd.f32 %v1093_v39, %v2002_v36 }
 0x519   : > { %1097 = vst [vmem:[%s1956_s18 + $0x8] sm:$0xff] %v1095_v6 }
 0x51a   : > { %1629 = shalt.err (!%p1626_p3)
}
 0x51b   : > { %s1630_s8 = scalar_lea.hbm %s2314_s23, 256  ;;  %s1634_s22 = scalar_lea.hbm %s2408_s17, 1024 }
 0x51c   : > { %p1631_p11 = scmp.ne.s32.totalorder %s2314_s23, %s1630_s8  ;;  %p1635_p8 = scmp.lt.u32.totalorder %s2314_s23, %s2408_s17 }
 0x51d   : > { %p1636_p10 = scmp.lt.u32.totalorder %s1634_s22, %s1630_s8  ;;  %p1638_p7 = scmp.lt.u32.totalorder %s1630_s8, %s2314_s23 }
 0x51e   : > { %p1632_p13 = pnand %p1631_p11, %p2409_p2 }
 0x51f   : > { %p1637_p12 = por %p1636_p10, %p1635_p8 }
 0x520   : > { %p1633_p5 = pneg %p1632_p13 }
 0x521   : > { %p1639_p4 = por %p1638_p7, %p1637_p12 }
 0x523   : > { %p1640_p0 = pnand %p1639_p4, %p1633_p5 }
 0x525   : > { %1643 = shalt.err (!%p1640_p0)
}
 0x526   : > { %s1748_s15 = smov 128   ;;  %s1749_s24 = smov 256  }
 0x527   : > { %s1750_s26 = smov 8  }
 0x528   : > { %1324 = dma.vmem_to_hbm [thread:$0]  (%p2409_p2), %s2309_s20, 256, %s2314_s23, %s2321_s13, %s1748_s15, %s1749_s24, %s1750_s26  }
 0x529 PF: > { %p1335_p1 = scmp.ge.s32.totalorder %s1738_s16, 2  ;;  %s1128_s25 = sand.u32 1, %s1698_s29  }
 0x52a   : > { %p2410_p6 = scmp.ne.s32.totalorder %s2405_s7, 0  ;;  %s1129_s8 = scalar_lea.sflag [#allocation7], %s1128_s25 }
 0x52c   : > { %p1331_p9 = pnand %p1335_p1, %p2410_p6 }
 0x52e   : > { %1693 = dma.done.wait (!%p1331_p9), %s1129_s8, 256  }
 0x52f   : > { %1695 = vsyncadd (!%p1331_p9), %s1129_s8, 4294967040  ;;  %s25_s16 = sadd.s32 1, %s1738_s16   ;;  %s2411_s28 = smov %s1886_s10 }
 0x530   : > { %p22_p3 = scmp.ge.s32.totalorder %s25_s16, 6   ;;  %s2412_s13 = sld [smem:[#allocation11_spill]] }
 0x531   : > { %s2413_s14 = sld [smem:[#allocation12_spill]]  ;;  %s2414_s7 = sld [smem:[#allocation13_spill]] }
 0x532   : > { %s2415_s15 = sld [smem:[#allocation14_spill]]  ;;  %s2416_s29 = smov %s1702_s30 }
 0x533   : > { %s2417_s30 = smov %s1706_s9  ;;  %s2418_s9 = smov %s1889_s19 }
 0x534   : > { %s2419_s10 = smov %s1714_s11  ;;  %s2420_s11 = smov %s1718_s12 }
 0x535   : > { %s2421_s12 = smov %s2411_s28  ;;  %24 = sbr.rel (!%p22_p3) target bundleno = 12 (0xc), region = 102 }
 0x53c   :  { %1134 = vsyncpa [#allocation6], 1 }
 0x53d   :  { %1136 = vsyncpa [#allocation6 + $0x1], 1 }
 0x53e   :  { %1137 = vsyncpa [#allocation7], 1 }
 0x53f   :  { %1139 = vsyncpa [#allocation7 + $0x1], 1 }

</bundles_post_ra>
